<compile_context>
chip_gen: v6e
topology: v6e:2x2x1
jax: 0.10.0
libtpu: 0.0.40
codegen_flags: <defaults>
</compile_context>

<pallas_src>
import jax
import jax.numpy as jnp
from jax.experimental import pallas as pl
from jax.experimental.pallas import tpu as pltpu

_LANES = 512  # lane-dense last dim (multiple of 128)


def _h_swish_kernel(x_ref, o_ref):
    x = x_ref[...]
    # h_sigmoid(x) = ReLU6(x + 3) / 6 ; h_swish(x) = x * h_sigmoid(x)
    # Python-float constants are weakly typed, so bf16 inputs stay bf16.
    hs = jnp.clip(x + 3.0, 0.0, 6.0) * (1.0 / 6.0)
    o_ref[...] = (x * hs).astype(o_ref.dtype)


def _tile_budget():
    """Return (target tile bytes, scoped VMEM limit bytes) per TPU generation."""
    try:
        kind = jax.devices()[0].device_kind.lower()
    except Exception:
        kind = ""
    if "v5 lite" in kind or "v5e" in kind or "v5lite" in kind:
        # v5e: 2 MiB tiles already sit at the HBM roofline; stay at the
        # 16 MiB scoped-VMEM default (footprint = 2 MiB * 2 bufs * in+out = 8 MiB).
        return 2 * 1024 * 1024, 16 * 1024 * 1024
    # v6e / v7x (and unknown chips): 4 MiB tiles amortize the ~0.35 us per-step
    # overhead; double-buffered in+out footprint is 16 MiB -> ask for 32 MiB.
    return 4 * 1024 * 1024, 32 * 1024 * 1024


def h_swish(x):
    """Elementwise x * relu6(x + 3) / 6. Any shape / float dtype; shape preserved."""
    orig_shape = x.shape
    dtype = x.dtype
    total = x.size
    itemsize = jnp.dtype(dtype).itemsize

    tile_bytes, vmem_limit = _tile_budget()

    # Sublane packing: 8 rows per vreg at 32-bit, 16 at 16-bit, 32 at 8-bit.
    sublane = 8 * max(1, 4 // itemsize)

    # Rows of the lane-dense slab. Pad ONLY when the element count is not
    # already a multiple of the lane width (common case: no pad, no slice).
    rows = pl.cdiv(total, _LANES)
    padded_total = rows * _LANES
    needs_pad = padded_total != total

    x_flat = x.reshape(-1)
    if needs_pad:
        x_flat = jnp.pad(x_flat, (0, padded_total - total))
    x2d = x_flat.reshape(rows, _LANES)

    # Row-tile sizing:
    #  * block rows are a multiple of `sublane` (or equal the full row count),
    #  * ~tile_bytes per input block,
    #  * >= 2 tiles (even when possible) so both v7x TensorCores get work.
    # The row count does NOT have to divide evenly by the tile: the edge block
    # is a partial block whose stores Pallas masks automatically.
    if rows <= sublane:
        tile_rows = rows  # single block == full array dims (tiny input)
    else:
        base = max(sublane, (tile_bytes // (_LANES * itemsize)) // sublane * sublane)
        num_tiles = max(2, pl.cdiv(rows, base))
        if num_tiles % 2:
            num_tiles += 1
        tile_rows = max(sublane, pl.cdiv(pl.cdiv(rows, num_tiles), sublane) * sublane)
    grid = (pl.cdiv(rows, tile_rows),)

    out2d = pl.pallas_call(
        _h_swish_kernel,
        out_shape=jax.ShapeDtypeStruct((rows, _LANES), dtype),
        grid_spec=pltpu.PrefetchScalarGridSpec(
            num_scalar_prefetch=0,
            grid=grid,
            in_specs=[pl.BlockSpec((tile_rows, _LANES), lambda i: (i, 0))],
            out_specs=pl.BlockSpec((tile_rows, _LANES), lambda i: (i, 0)),
        ),
        compiler_params=pltpu.CompilerParams(
            dimension_semantics=("parallel",),
            vmem_limit_bytes=vmem_limit,
        ),
        # Alias only when the pad branch materialized a fresh wrapper-local slab.
        # In the no-pad path x2d is a view of the caller's input and aliasing it
        # would force a defensive full-tensor copy.
        input_output_aliases={0: 0} if needs_pad else {},
        cost_estimate=pl.CostEstimate(
            flops=4 * padded_total,
            transcendentals=0,
            bytes_accessed=2 * padded_total * itemsize,
        ),
    )(x2d)

    out_flat = out2d.reshape(-1)
    if needs_pad:
        out_flat = out_flat[:total]
    return out_flat.reshape(orig_shape)


def h_swish_ref(x):
    return x * (jnp.clip(x + 3.0, 0.0, 6.0) / 6.0)


if __name__ == "__main__":
    key = jax.random.PRNGKey(0)

    # Module-consistent shape (NCHW): batch=2, channels=4, spatial=16x16.
    x = jax.random.normal(key, (2, 4, 16, 16), dtype=jnp.float32) * 4.0
    out = jax.block_until_ready(h_swish(x))
    ref = h_swish_ref(x)
    assert out.shape == x.shape and out.dtype == x.dtype
    assert jnp.allclose(out, ref, atol=1e-6, rtol=1e-6)

    # Pad-path sanity check (element count not a multiple of 512).
    x2 = jax.random.normal(key, (3, 5, 7, 11), dtype=jnp.float32) * 4.0
    out2 = jax.block_until_ready(h_swish(x2))
    assert jnp.allclose(out2, h_swish_ref(x2), atol=1e-6, rtol=1e-6)

    # Multi-tile path with a masked partial edge block (33 rows, no pad).
    x3 = jax.random.normal(key, (4, 8, 33, 16), dtype=jnp.float32) * 4.0
    out3 = jax.block_until_ready(h_swish(x3))
    assert jnp.allclose(out3, h_swish_ref(x3), atol=1e-6, rtol=1e-6)

    print("KERNEL_OK")
</pallas_src>

<mosaic_0001>
module attributes {stable_mosaic.version = 11 : i64} {
  func.func @_h_swish_kernel(%arg0: i32, %arg1: memref<4x512xf32, #tpu.memory_space<vmem>>, %arg2: memref<4x512xf32, #tpu.memory_space<vmem>>) attributes {dimension_semantics = [#tpu.dimension_semantics<parallel>], iteration_bounds = array<i64: 1>, scalar_prefetch = 0 : i64, scratch_operands = 0 : i64, tpu.core_type = #tpu.core_type<tc>, window_params = [{transform_indices = @transform_0, window_bounds = array<i64: 4, 512>}, {transform_indices = @transform_1, window_bounds = array<i64: 4, 512>}]} {
    %c0 = arith.constant 0 : index
    %c0_0 = arith.constant 0 : index
    %0 = vector.load %arg1[%c0, %c0_0] : memref<4x512xf32, #tpu.memory_space<vmem>>, vector<4x512xf32>
    %cst = arith.constant 3.000000e+00 : f32
    %1 = vector.broadcast %cst : f32 to vector<4x512xf32>
    %2 = arith.addf %0, %1 : vector<4x512xf32>
    %cst_1 = arith.constant 0.000000e+00 : f32
    %cst_2 = arith.constant 6.000000e+00 : f32
    %3 = vector.broadcast %cst_1 : f32 to vector<4x512xf32>
    %4 = arith.maximumf %3, %2 : vector<4x512xf32>
    %5 = vector.broadcast %cst_2 : f32 to vector<4x512xf32>
    %6 = arith.minimumf %5, %4 : vector<4x512xf32>
    %cst_3 = arith.constant 0.166666672 : f32
    %7 = vector.broadcast %cst_3 : f32 to vector<4x512xf32>
    %8 = arith.mulf %6, %7 : vector<4x512xf32>
    %9 = arith.mulf %0, %8 : vector<4x512xf32>
    %c0_4 = arith.constant 0 : index
    %c0_5 = arith.constant 0 : index
    %10 = vector.load %arg2[%c0_4, %c0_5] : memref<4x512xf32, #tpu.memory_space<vmem>>, vector<4x512xf32>
    tpu.vector_store %arg2[%c0_4, %c0_5], %9 {strides = array<i32>} : memref<4x512xf32, #tpu.memory_space<vmem>>, vector<4x512xf32>,
    return
  }
  func.func @transform_0(%arg0: i32) -> (i32, i32) {
    %c0_i32 = arith.constant 0 : i32
    %c0_i32_0 = arith.constant 0 : i32
    return %arg0, %c0_i32 : i32, i32
  }
  func.func @transform_1(%arg0: i32) -> (i32, i32) {
    %c0_i32 = arith.constant 0 : i32
    %c0_i32_0 = arith.constant 0 : i32
    return %arg0, %c0_i32 : i32, i32
  }
}

</mosaic_0001>

<bundles_post_ra>
// kernel: tpu_custom_call.1
= control target key start
LH: loop header
LB: loop body
LE: loop exit
PB: predicated region body
PF: predicated region fallthrough
CT: control target
= control target key end

     0   :  { %6 = vsyncpa [#allocation3], 0  ;;  %s114_s0 = inlined_call_operand.hbm [shape: f32[4,512], index: 0, kind: input, shape index: {}]   ;;  %s115_s1 = inlined_call_operand.hbm [shape: f32[4,512], index: 1, kind: output, shape index: {}]  }
   0x1   :  { %7 = vsyncpa [#allocation4], 0  ;;  %s96_s6 = smov [#allocation2]  }
   0x2   :  { %s14_s7 = sshll.u32 %s96_s6, 4  ;;  %s15_s7 = int_to_ptr.vmem [resolvable:$true] %s14_s7 }
   0x3   :  { %s60_s8 = scalar_lea.vmem %s15_s7, 256  ;;  %p65_p1 = scmp.lt.s32.totalorder %s15_s7, %s15_s7 }
   0x4   :  { %p61_p0 = scmp.ne.s32.totalorder %s15_s7, %s60_s8  ;;  %p66_p2 = scmp.lt.s32.totalorder %s60_s8, %s60_s8 }
   0x6   :  { %p67_p3 = por %p66_p2, %p65_p1 }
   0x8   :  { %p68_p4 = pnand %p67_p3, %p61_p0 }
   0xa   :  { %71 = shalt.err (!%p68_p4)
}
   0xb   :  { %17 = dma.hbm_to_vmem [thread:$0]  %s114_s0, 256, %s15_s7, [#allocation3]  }
   0xc   :  { %92 = dma.done.wait [#allocation3], 256  }
   0xd   :  { %93 = vsyncadd [#allocation3], 4294967040  ;;  %v21_v0 = vld [vmem:[#allocation2] sm:$0xff]  ;;  %v22_v1 = vld [vmem:[#allocation2 + $0x8] sm:$0xff]  ;;  %s97_s11 = smov [#allocation5]  }
   0xe   :  { %v23_v2 = vadd.f32 3.0, %v21_v0  ;;  %v24_v3 = vadd.f32 3.0, %v22_v1  ;;  %s41_s12 = sshll.u32 %s97_s11, 4  ;;  %s42_s12 = int_to_ptr.vmem [resolvable:$true] %s41_s12 }
   0xf   :  { %s72_s0 = scalar_lea.vmem %s42_s12, 256  ;;  %p77_p6 = scmp.lt.s32.totalorder %s42_s12, %s42_s12 }
  0x10   :  { %v25_v4 = vmax.f32 %v23_v2, 0.0  ;;  %v26_v5 = vmax.f32 %v24_v3, 0.0  ;;  %p73_p5 = scmp.ne.s32.totalorder %s42_s12, %s72_s0  ;;  %p78_p7 = scmp.lt.s32.totalorder %s72_s0, %s72_s0 }
  0x12   :  { %v27_v6 = vmin.f32 %v25_v4, 6.0  ;;  %v28_v7 = vmin.f32 %v26_v5, 6.0  ;;  %p79_p8 = por %p78_p7, %p77_p6 }
  0x14   :  { %v29_v8 = vmul.f32 0.16666667, %v27_v6  ;;  %v30_v9 = vmul.f32 0.16666667, %v28_v7  ;;  %p80_p9 = pnand %p79_p8, %p73_p5 }
  0x16   :  { %v31_v10 = vmul.f32 %v29_v8, %v21_v0  ;;  %v32_v11 = vmul.f32 %v30_v9, %v22_v1 }
  0x18   :  { %33 = vst [vmem:[#allocation5] sm:$0xff] %v31_v10  ;;  %34 = vst [vmem:[#allocation5 + $0x8] sm:$0xff] %v32_v11 }
  0x19   :  { %83 = shalt.err (!%p80_p9)
}
  0x1a   :  { %44 = dma.vmem_to_hbm [thread:$0]  %s42_s12, 256, %s115_s1, [#allocation4]  }
  0x1b   :  { %94 = dma.done.wait [#allocation4], 256  }
  0x1c   :  { %95 = vsyncadd [#allocation4], 4294967040 }
  0x1d   :  { %48 = vsyncpa [#allocation3], 1 }
  0x1e   :  { %49 = vsyncpa [#allocation4], 1 }

</bundles_post_ra>
